<compile_context>
chip_gen: v7x
topology: tpu7x:2x2x1
jax: 0.10.0
libtpu: 0.0.40
codegen_flags: <defaults>
</compile_context>

<pallas_src>
import functools
import math

import jax
import jax.numpy as jnp
from jax.experimental import pallas as pl
from jax.experimental.pallas import tpu as pltpu


def _round_up(n, m):
    return ((n + m - 1) // m) * m


def gcnii_kernel(a_ref, x_ref, w0_ref, b0_ref, wconv_ref, wout_ref, bout_ref,
                 o_ref, *, alpha, num_layers):
    """Whole-graph GCNII forward on a single VMEM-resident block.

    a_ref     : (Np, Np)   bf16, holds (1 - alpha) * A_hat (pre-scaled, zero-padded)
    x_ref     : (Np, Fp)   bf16, zero-padded node features
    w0_ref    : (Fp, H)    bf16, zero rows for the padded input features
    b0_ref    : (1, H)     f32
    wconv_ref : (L, H, H)  bf16, wconv_eff[l] = (1-beta_l)*I + beta_l*W_l
    wout_ref  : (H, Op)    bf16, zero-padded output columns (lane-dense)
    bout_ref  : (1, Op)    f32
    o_ref     : (Np, Op)   f32
    """
    # lins[0] + relu -> x_0  (bf16 MXU operands, f32 accumulation).
    x0 = jnp.dot(x_ref[...], w0_ref[...],
                 preferred_element_type=jnp.float32) + b0_ref[...]
    x0 = jnp.maximum(x0, 0.0)                 # (Np, H) f32
    alpha_x0 = alpha * x0                     # hoisted residual term (f32)

    def layer(l, h):
        # h is carried in bf16; A is re-read from VMEM at the dot site (VMEM->vreg
        # loads pipeline under the matmul for free) rather than pinned in vregs.
        # propagate + initial residual: t = (1-alpha)*(A_hat @ h) + alpha*x0
        t = jnp.dot(a_ref[...], h, preferred_element_type=jnp.float32) + alpha_x0
        # identity mapping folded into the weight:
        #   relu((1-beta)*t + beta*(t @ W_l)) == relu(t @ ((1-beta)*I + beta*W_l))
        h_new = jnp.dot(t.astype(jnp.bfloat16), wconv_ref[l],
                        preferred_element_type=jnp.float32)
        return jnp.maximum(h_new, 0.0).astype(jnp.bfloat16)

    h = jax.lax.fori_loop(0, num_layers, layer, x0.astype(jnp.bfloat16))

    # lins[1] into a lane-dense (Np, Op) slab (Op multiple of 128 -> unmasked vst).
    o_ref[...] = jnp.dot(h, wout_ref[...],
                         preferred_element_type=jnp.float32) + bout_ref[...]


def prepare_gcnii(a_hat, w0, b0, wconv, wout, bout, *, alpha, theta):
    """One-time (per-checkpoint / per-graph) prep: scalar folds, bf16 casts,
    tile padding, and construction of the pallas_call.  Cache the result —
    never rebuild a_s / wconv_eff per forward."""
    n = a_hat.shape[0]
    in_f, hidden = w0.shape
    out_f = wout.shape[1]
    num_layers = wconv.shape[0]

    n_pad = _round_up(n, 128)        # full MXU tiles for the propagate matmul
    in_pad = _round_up(in_f, 128)    # lane-dense x block / dense K for lins[0]
    out_pad = _round_up(out_f, 128)  # lane-dense output stores

    betas = jnp.asarray(
        [math.log(theta / (l + 1) + 1.0) for l in range(num_layers)], jnp.float32)

    # (1 - alpha) folded into A_hat, zero-padded, bf16.  Padded columns are zero,
    # so garbage padded rows of h never contaminate real rows.
    a_s = jnp.zeros((n_pad, n_pad), jnp.float32).at[:n, :n].set(
        (1.0 - alpha) * a_hat).astype(jnp.bfloat16)
    # lins[0]: pad K dim with zero rows (padded x columns are inert).
    w0_p = jnp.zeros((in_pad, hidden), jnp.float32).at[:in_f, :].set(
        w0).astype(jnp.bfloat16)
    b0_r = b0.reshape(1, -1).astype(jnp.float32)
    # Identity mapping folded into the conv weights.
    eye = jnp.eye(hidden, dtype=jnp.float32)
    wconv_eff = ((1.0 - betas)[:, None, None] * eye[None, :, :]
                 + betas[:, None, None] * wconv).astype(jnp.bfloat16)
    # lins[1]: lane-dense padded output columns.
    wout_p = jnp.zeros((hidden, out_pad), jnp.float32).at[:, :out_f].set(
        wout).astype(jnp.bfloat16)
    bout_p = jnp.zeros((1, out_pad), jnp.float32).at[0, :out_f].set(bout)

    params = jax.block_until_ready((a_s, w0_p, b0_r, wconv_eff, wout_p, bout_p))

    # VMEM budget / cost estimate derived from the actual resident set.
    io_bytes = (a_s.size * 2 + n_pad * in_pad * 2 + w0_p.size * 2 + b0_r.size * 4
                + wconv_eff.size * 2 + wout_p.size * 2 + bout_p.size * 4
                + n_pad * out_pad * 4)
    act_bytes = 4 * n_pad * hidden * 4      # x0, alpha_x0, t + spill headroom (f32)
    vmem_limit = int(min(2 * (io_bytes + act_bytes) + (1 << 20), 96 << 20))
    flops = (2 * n_pad * in_pad * hidden
             + num_layers * (2 * n_pad * n_pad * hidden + 2 * n_pad * hidden * hidden)
             + 2 * n_pad * hidden * out_pad)

    kernel = functools.partial(gcnii_kernel, alpha=float(alpha),
                               num_layers=int(num_layers))
    vspec = pl.BlockSpec(memory_space=pltpu.MemorySpace.VMEM)
    call = pl.pallas_call(
        kernel,
        out_shape=jax.ShapeDtypeStruct((n_pad, out_pad), jnp.float32),
        in_specs=[vspec] * 7,
        out_specs=vspec,
        compiler_params=pltpu.CompilerParams(vmem_limit_bytes=vmem_limit),
        cost_estimate=pl.CostEstimate(flops=flops, transcendentals=0,
                                      bytes_accessed=io_bytes),
    )
    return dict(call=call, params=params, n=n, n_pad=n_pad,
                in_f=in_f, in_pad=in_pad, out_f=out_f)


def gcnii_apply(prep, x):
    """Per-forward path: pad/cast x, run the kernel, slice off padding."""
    n, n_pad = prep["n"], prep["n_pad"]
    in_f, in_pad = prep["in_f"], prep["in_pad"]
    x_p = jnp.zeros((n_pad, in_pad), jnp.float32).at[:n, :in_f].set(
        x).astype(jnp.bfloat16)
    a_s, w0_p, b0_r, wconv_eff, wout_p, bout_p = prep["params"]
    out = prep["call"](a_s, x_p, w0_p, b0_r, wconv_eff, wout_p, bout_p)
    return out[:n, :prep["out_f"]]


def gcn_norm_dense(edge_index, num_nodes):
    """gcn_norm (add self loops, symmetric D^-1/2 A D^-1/2) -> dense A_hat."""
    row, col = edge_index
    loop = jnp.arange(num_nodes, dtype=row.dtype)
    row = jnp.concatenate([row, loop])
    col = jnp.concatenate([col, loop])
    w = jnp.ones(row.shape[0], jnp.float32)
    deg = jnp.zeros(num_nodes, jnp.float32).at[col].add(w)
    d_inv_sqrt = jnp.where(deg > 0, 1.0 / jnp.sqrt(deg), 0.0)
    vals = d_inv_sqrt[row] * w * d_inv_sqrt[col]
    a = jnp.zeros((num_nodes, num_nodes), jnp.float32).at[row, col].add(vals)
    return a


def reference_forward_f32(a_hat, x, w0, b0, wconv, wout, bout, *, alpha, theta):
    """Pure-f32 JAX reference (mirrors the PyTorch module exactly)."""
    x0 = jax.nn.relu(x @ w0 + b0)
    h = x0
    for l in range(wconv.shape[0]):
        beta = math.log(theta / (l + 1) + 1.0)
        t = (1.0 - alpha) * (a_hat @ h) + alpha * x0
        h = jax.nn.relu((1.0 - beta) * t + beta * (t @ wconv[l]))
    return h @ wout + bout


def reference_forward_bf16(a_hat, x, w0, b0, wconv, wout, bout, *, alpha, theta):
    """JAX reference mirroring the kernel's bf16-operand / f32-accumulate numerics
    (including the (1-beta)*I weight fold and bf16-carried h)."""
    num_layers = wconv.shape[0]
    hidden = w0.shape[1]
    a_s = ((1.0 - alpha) * a_hat).astype(jnp.bfloat16)
    x0 = jnp.dot(x.astype(jnp.bfloat16), w0.astype(jnp.bfloat16),
                 preferred_element_type=jnp.float32) + b0
    x0 = jnp.maximum(x0, 0.0)
    h = x0.astype(jnp.bfloat16)
    eye = jnp.eye(hidden, dtype=jnp.float32)
    for l in range(num_layers):
        beta = math.log(theta / (l + 1) + 1.0)
        w_eff = ((1.0 - beta) * eye + beta * wconv[l]).astype(jnp.bfloat16)
        t = jnp.dot(a_s, h, preferred_element_type=jnp.float32) + alpha * x0
        h = jnp.maximum(
            jnp.dot(t.astype(jnp.bfloat16), w_eff,
                    preferred_element_type=jnp.float32), 0.0).astype(jnp.bfloat16)
    return jnp.dot(h, wout.astype(jnp.bfloat16),
                   preferred_element_type=jnp.float32) + bout


if __name__ == "__main__":
    # Hyper-parameters (module __init__ signature).
    N = 64               # number of graph nodes
    IN_FEATURES = 16
    HIDDEN = 128
    OUT_FEATURES = 8
    NUM_LAYERS = 4
    ALPHA = 0.1
    THETA = 0.5

    key = jax.random.PRNGKey(0)
    k_adj, k_x, k_w0, k_b0, k_wc, k_wo, k_bo = jax.random.split(key, 7)

    # Deterministic synthetic graph -> edge_index -> gcn_norm'd dense A_hat.
    mask = jax.random.bernoulli(k_adj, p=0.1, shape=(N, N))
    mask = jnp.logical_or(mask, mask.T)                       # symmetric
    mask = mask & ~jnp.eye(N, dtype=bool)                     # no self loops (gcn_norm adds them)
    row_idx, col_idx = jnp.nonzero(mask)                      # concrete, outside jit
    edge_index = jnp.stack([row_idx, col_idx]).astype(jnp.int32)
    a_hat = gcn_norm_dense(edge_index, N)

    # Node features.
    x = jax.random.normal(k_x, (N, IN_FEATURES), dtype=jnp.float32)

    # Deterministic parameter init (synthetic, not a checkpoint).
    w0 = jax.random.uniform(k_w0, (IN_FEATURES, HIDDEN), jnp.float32,
                            -1.0, 1.0) / math.sqrt(IN_FEATURES)
    b0 = jax.random.uniform(k_b0, (HIDDEN,), jnp.float32,
                            -1.0, 1.0) / math.sqrt(IN_FEATURES)
    wconv = jax.random.uniform(k_wc, (NUM_LAYERS, HIDDEN, HIDDEN), jnp.float32,
                               -1.0, 1.0) / math.sqrt(HIDDEN)
    wout = jax.random.uniform(k_wo, (HIDDEN, OUT_FEATURES), jnp.float32,
                              -1.0, 1.0) / math.sqrt(HIDDEN)
    bout = jax.random.uniform(k_bo, (OUT_FEATURES,), jnp.float32,
                              -1.0, 1.0) / math.sqrt(HIDDEN)

    # One-time prep (cached across forwards), then the per-call path.
    prep = prepare_gcnii(a_hat, w0, b0, wconv, wout, bout,
                         alpha=ALPHA, theta=THETA)
    out = gcnii_apply(prep, x)
    out = jax.block_until_ready(out)
    assert out.shape == (N, OUT_FEATURES)

    # Tight check vs a reference with identical bf16-operand numerics.
    ref_bf16 = reference_forward_bf16(a_hat, x, w0, b0, wconv, wout, bout,
                                      alpha=ALPHA, theta=THETA)
    assert jnp.allclose(out, ref_bf16, atol=2e-3, rtol=2e-3), \
        "mismatch vs bf16-mirror JAX reference"

    # Looser check vs the pure-f32 module semantics (bf16 operand quantization
    # over 4 propagate layers introduces ~1e-2 relative error).
    ref_f32 = reference_forward_f32(a_hat, x, w0, b0, wconv, wout, bout,
                                    alpha=ALPHA, theta=THETA)
    assert jnp.allclose(out, ref_f32, atol=5e-2, rtol=5e-2), \
        "mismatch vs f32 JAX reference"

    print("KERNEL_OK")
</pallas_src>

<mosaic_0001>
module attributes {stable_mosaic.version = 11 : i64} {
  func.func @gcnii_kernel(%arg0: memref<128x128xbf16, #tpu.memory_space<vmem>>, %arg1: memref<128x128xbf16, #tpu.memory_space<vmem>>, %arg2: memref<128x128xbf16, #tpu.memory_space<vmem>>, %arg3: memref<1x128xf32, #tpu.memory_space<vmem>>, %arg4: memref<4x128x128xbf16, #tpu.memory_space<vmem>>, %arg5: memref<128x128xbf16, #tpu.memory_space<vmem>>, %arg6: memref<1x128xf32, #tpu.memory_space<vmem>>, %arg7: memref<128x128xf32, #tpu.memory_space<vmem>>) attributes {dimension_semantics = [], scalar_prefetch = 0 : i64, scratch_operands = 0 : i64, tpu.core_type = #tpu.core_type<tc>} {
    %c0 = arith.constant 0 : index
    %c0_0 = arith.constant 0 : index
    %0 = vector.load %arg1[%c0, %c0_0] : memref<128x128xbf16, #tpu.memory_space<vmem>>, vector<128x128xbf16>
    %c0_1 = arith.constant 0 : index
    %c0_2 = arith.constant 0 : index
    %1 = vector.load %arg2[%c0_1, %c0_2] : memref<128x128xbf16, #tpu.memory_space<vmem>>, vector<128x128xbf16>
    %cst = arith.constant dense<0.000000e+00> : vector<128x128xf32>
    %2 = tpu.matmul %0, %1, %cst {dimension_numbers = #tpu.dot_dimension_numbers<[1], [0], [0], [1], [0, 0, 1, 1], [], []>} : vector<128x128xbf16>, vector<128x128xbf16>, vector<128x128xf32> -> vector<128x128xf32>
    %c0_3 = arith.constant 0 : index
    %c0_4 = arith.constant 0 : index
    %3 = vector.load %arg3[%c0_3, %c0_4] : memref<1x128xf32, #tpu.memory_space<vmem>>, vector<1x128xf32>
    %4 = vector.broadcast %3 : vector<1x128xf32> to vector<128x128xf32>
    %5 = arith.addf %2, %4 : vector<128x128xf32>
    %cst_5 = arith.constant 0.000000e+00 : f32
    %6 = vector.broadcast %cst_5 : f32 to vector<128x128xf32>
    %7 = arith.maximumf %5, %6 : vector<128x128xf32>
    %cst_6 = arith.constant 1.000000e-01 : f32
    %8 = vector.broadcast %cst_6 : f32 to vector<128x128xf32>
    %9 = arith.mulf %8, %7 : vector<128x128xf32>
    %10 = arith.truncf %7 : vector<128x128xf32> to vector<128x128xbf16>
    %c0_i32 = arith.constant 0 : i32
    %c4_i32 = arith.constant 4 : i32
    %11 = arith.addi %c0_i32, %c4_i32 : i32
    %c1_i32 = arith.constant 1 : i32
    %12 = scf.for %arg8 = %c0_i32 to %11 step %c1_i32 iter_args(%arg9 = %10) -> (vector<128x128xbf16>)  : i32 {
      %c0_15 = arith.constant 0 : index
      %c0_16 = arith.constant 0 : index
      %19 = vector.load %arg0[%c0_15, %c0_16] : memref<128x128xbf16, #tpu.memory_space<vmem>>, vector<128x128xbf16>
      %cst_17 = arith.constant dense<0.000000e+00> : vector<128x128xf32>
      %20 = tpu.matmul %19, %arg9, %cst_17 {dimension_numbers = #tpu.dot_dimension_numbers<[1], [0], [0], [1], [0, 0, 1, 1], [], []>} : vector<128x128xbf16>, vector<128x128xbf16>, vector<128x128xf32> -> vector<128x128xf32>
      %21 = arith.addf %20, %9 : vector<128x128xf32>
      %22 = arith.truncf %21 : vector<128x128xf32> to vector<128x128xbf16>
      %23 = arith.index_cast %arg8 : i32 to index
      %c0_18 = arith.constant 0 : index
      %c0_19 = arith.constant 0 : index
      %24 = vector.load %arg4[%23, %c0_18, %c0_19] : memref<4x128x128xbf16, #tpu.memory_space<vmem>>, vector<1x128x128xbf16>
      %25 = vector.shape_cast %24 : vector<1x128x128xbf16> to vector<128x128xbf16>
      %cst_20 = arith.constant dense<0.000000e+00> : vector<128x128xf32>
      %26 = tpu.matmul %22, %25, %cst_20 {dimension_numbers = #tpu.dot_dimension_numbers<[1], [0], [0], [1], [0, 0, 1, 1], [], []>} : vector<128x128xbf16>, vector<128x128xbf16>, vector<128x128xf32> -> vector<128x128xf32>
      %cst_21 = arith.constant 0.000000e+00 : f32
      %27 = vector.broadcast %cst_21 : f32 to vector<128x128xf32>
      %28 = arith.maximumf %26, %27 : vector<128x128xf32>
      %29 = arith.truncf %28 : vector<128x128xf32> to vector<128x128xbf16>
      scf.yield %29 : vector<128x128xbf16>
    }
    %c4_i32_7 = arith.constant 4 : i32
    %c0_8 = arith.constant 0 : index
    %c0_9 = arith.constant 0 : index
    %13 = vector.load %arg5[%c0_8, %c0_9] : memref<128x128xbf16, #tpu.memory_space<vmem>>, vector<128x128xbf16>
    %cst_10 = arith.constant dense<0.000000e+00> : vector<128x128xf32>
    %14 = tpu.matmul %12, %13, %cst_10 {dimension_numbers = #tpu.dot_dimension_numbers<[1], [0], [0], [1], [0, 0, 1, 1], [], []>} : vector<128x128xbf16>, vector<128x128xbf16>, vector<128x128xf32> -> vector<128x128xf32>
    %c0_11 = arith.constant 0 : index
    %c0_12 = arith.constant 0 : index
    %15 = vector.load %arg6[%c0_11, %c0_12] : memref<1x128xf32, #tpu.memory_space<vmem>>, vector<1x128xf32>
    %16 = vector.broadcast %15 : vector<1x128xf32> to vector<128x128xf32>
    %17 = arith.addf %14, %16 : vector<128x128xf32>
    %c0_13 = arith.constant 0 : index
    %c0_14 = arith.constant 0 : index
    %18 = vector.load %arg7[%c0_13, %c0_14] : memref<128x128xf32, #tpu.memory_space<vmem>>, vector<128x128xf32>
    tpu.vector_store %arg7[%c0_13, %c0_14], %17 {strides = array<i32>} : memref<128x128xf32, #tpu.memory_space<vmem>>, vector<128x128xf32>,
    return
  }
}

</mosaic_0001>

<bundles_post_ra>
// kernel: tpu_custom_call.1
= control target key start
LH: loop header
LB: loop body
LE: loop exit
PB: predicated region body
PF: predicated region fallthrough
CT: control target
= control target key end

     0   :  { %12 = vsyncpa [#allocation3], 0  ;;  %s1856_s0 = inlined_call_operand.hbm [shape: bf16[128,128], index: 0, kind: input, shape index: {}]   ;;  %s1857_s1 = inlined_call_operand.hbm [shape: bf16[128,128], index: 1, kind: input, shape index: {}]   ;;  %s1858_s2 = inlined_call_operand.hbm [shape: bf16[128,128], index: 2, kind: input, shape index: {}]   ;;  %s1859_s3 = inlined_call_operand.vmem [shape: f32[1,128], index: 3, kind: input, shape index: {}]   ;;  %s1860_s4 = inlined_call_operand.hbm [shape: bf16[4,128,128], index: 4, kind: input, shape index: {}]   ;;  %s1861_s5 = inlined_call_operand.hbm [shape: bf16[128,128], index: 5, kind: input, shape index: {}]   ;;  %s1862_s6 = inlined_call_operand.vmem [shape: f32[1,128], index: 6, kind: input, shape index: {}]   ;;  %s1863_s7 = inlined_call_operand.hbm [shape: f32[128,128], index: 7, kind: output, shape index: {}]  }
   0x1   :  { %13 = vsyncpa [#allocation6], 0 }
   0x2   :  { %14 = vsyncpa [#allocation9], 0 }
   0x3   :  { %15 = vsyncpa [#allocation4], 0  ;;  %s1576_s24 = smov [#allocation5]   ;;  %s1577_s26 = smov [#allocation8]  }
   0x4   :  { %s33_s25 = sshll.u32 %s1576_s24, 4  ;;  %s59_s27 = sshll.u32 %s1577_s26, 4  ;;  %s34_s25 = int_to_ptr.vmem [resolvable:$true] %s33_s25  ;;  %s1626_s27 = int_to_ptr.vmem [resolvable:$true] %s59_s27 }
   0x5   :  { %s1364_s30 = scalar_lea.hbm %s1857_s1, 1024 }
   0x6   :  { %p1365_p0 = scmp.ne.s32.totalorder %s1857_s1, %s1364_s30  ;;  %p1368_p1 = scmp.lt.u32.totalorder %s1364_s30, %s1857_s1 }
   0x8   :  { %p1370_p2 = pnand %p1368_p1, %p1365_p0 }
   0xa   :  { %1373 = shalt.err (!%p1370_p2)
}
   0xb   :  { %s1374_s12 = scalar_lea.vmem %s34_s25, 1024  ;;  %p1379_p4 = scmp.lt.s32.totalorder %s34_s25, %s34_s25 }
   0xc   :  { %p1375_p3 = scmp.ne.s32.totalorder %s34_s25, %s1374_s12  ;;  %p1380_p5 = scmp.lt.s32.totalorder %s1374_s12, %s1374_s12 }
   0xe   :  { %p1381_p6 = por %p1380_p5, %p1379_p4 }
  0x10   :  { %p1382_p7 = pnand %p1381_p6, %p1375_p3 }
  0x12   :  { %1385 = shalt.err (!%p1382_p7)
}
  0x13   :  { %s1578_s13 = smov 64   ;;  %s1579_s14 = smov 4  }
  0x14   :  { %39 = dma.hbm_to_vmem [thread:$0]  %s1857_s1, 1024, %s34_s25, [#allocation6], %s1578_s13, %s1578_s13, %s1579_s14  }
  0x15   :  { %s1386_s19 = scalar_lea.hbm %s1860_s4, 4096 }
  0x16   :  { %p1387_p8 = scmp.ne.s32.totalorder %s1860_s4, %s1386_s19  ;;  %p1390_p9 = scmp.lt.u32.totalorder %s1386_s19, %s1860_s4 }
  0x18   :  { %p1392_p10 = pnand %p1390_p9, %p1387_p8 }
  0x1a   :  { %1395 = shalt.err (!%p1392_p10)
}
  0x1b   :  { %s1396_s24 = scalar_lea.vmem %s1626_s27, 4096  ;;  %p1401_p12 = scmp.lt.s32.totalorder %s1626_s27, %s1626_s27 }
  0x1c   :  { %p1397_p11 = scmp.ne.s32.totalorder %s1626_s27, %s1396_s24  ;;  %p1402_p13 = scmp.lt.s32.totalorder %s1396_s24, %s1396_s24 }
  0x1e   :  { %p1403_p0 = por %p1402_p13, %p1401_p12 }
  0x20   :  { %p1404_p1 = pnand %p1403_p0, %p1397_p11 }
  0x22   :  { %1407 = shalt.err (!%p1404_p1)
}
  0x23   :  { %65 = dma.hbm_to_vmem [thread:$0]  %s1860_s4, 4096, %s1626_s27, [#allocation9], %s1578_s13, %s1578_s13, %s1579_s14  }
  0x24   :  { %s1580_s26 = smov [#allocation2]   ;;  %s1581_s29 = smov [#allocation7]  }
  0x25   :  { %s21_s28 = sshll.u32 %s1580_s26, 4  ;;  %s45_s30 = sshll.u32 %s1581_s29, 4  ;;  %s22_s28 = int_to_ptr.vmem [resolvable:$true] %s21_s28  ;;  %s1663_s30 = int_to_ptr.vmem [resolvable:$true] %s45_s30 }
  0x26   :  { %s1408_s10 = scalar_lea.hbm %s1856_s0, 1024 }
  0x27   :  { %p1409_p2 = scmp.ne.s32.totalorder %s1856_s0, %s1408_s10  ;;  %p1412_p3 = scmp.lt.u32.totalorder %s1408_s10, %s1856_s0 }
  0x29   :  { %p1414_p4 = pnand %p1412_p3, %p1409_p2 }
  0x2b   :  { %1417 = shalt.err (!%p1414_p4)
}
  0x2c   :  { %s1418_s4 = scalar_lea.vmem %s22_s28, 1024  ;;  %p1423_p6 = scmp.lt.s32.totalorder %s22_s28, %s22_s28 }
  0x2d   :  { %p1419_p5 = scmp.ne.s32.totalorder %s22_s28, %s1418_s4  ;;  %p1424_p7 = scmp.lt.s32.totalorder %s1418_s4, %s1418_s4 }
  0x2f   :  { %p1425_p8 = por %p1424_p7, %p1423_p6 }
  0x31   :  { %p1426_p9 = pnand %p1425_p8, %p1419_p5 }
  0x33   :  { %1429 = shalt.err (!%p1426_p9)
}
  0x34   :  { %27 = dma.hbm_to_vmem [thread:$0]  %s1856_s0, 1024, %s22_s28, [#allocation3], %s1578_s13, %s1578_s13, %s1579_s14  }
  0x35   :  { %s1430_s20 = scalar_lea.hbm %s1858_s2, 1024 }
  0x36   :  { %p1431_p10 = scmp.ne.s32.totalorder %s1858_s2, %s1430_s20  ;;  %p1434_p11 = scmp.lt.u32.totalorder %s1430_s20, %s1858_s2 }
  0x38   :  { %p1436_p12 = pnand %p1434_p11, %p1431_p10 }
  0x3a   :  { %1439 = shalt.err (!%p1436_p12)
}
  0x3b   :  { %s1440_s1 = scalar_lea.vmem %s1663_s30, 1024  ;;  %p1445_p0 = scmp.lt.s32.totalorder %s1663_s30, %s1663_s30 }
  0x3c   :  { %p1441_p13 = scmp.ne.s32.totalorder %s1663_s30, %s1440_s1  ;;  %p1446_p1 = scmp.lt.s32.totalorder %s1440_s1, %s1440_s1 }
  0x3e   :  { %p1447_p2 = por %p1446_p1, %p1445_p0 }
  0x40   :  { %p1448_p3 = pnand %p1447_p2, %p1441_p13 }
  0x42   :  { %1451 = shalt.err (!%p1448_p3)
}
  0x43   :  { %51 = dma.hbm_to_vmem [thread:$0]  %s1858_s2, 1024, %s1663_s30, [#allocation6], %s1578_s13, %s1578_s13, %s1579_s14  }
  0x44   :  { %s1582_s26 = smov [#allocation10]   ;;  %s1452_s9 = scalar_lea.hbm %s1861_s5, 1024 }
  0x45   :  { %s71_s28 = sshll.u32 %s1582_s26, 4  ;;  %p1453_p4 = scmp.ne.s32.totalorder %s1861_s5, %s1452_s9  ;;  %s72_s28 = int_to_ptr.vmem [resolvable:$true] %s71_s28 }
  0x46   :  { %p1456_p5 = scmp.lt.u32.totalorder %s1452_s9, %s1861_s5 }
  0x48   :  { %p1458_p6 = pnand %p1456_p5, %p1453_p4 }
  0x4a   :  { %1461 = shalt.err (!%p1458_p6)
}
  0x4b   :  { %s1462_s16 = scalar_lea.vmem %s72_s28, 1024  ;;  %p1467_p8 = scmp.lt.s32.totalorder %s72_s28, %s72_s28 }
  0x4c   :  { %p1463_p7 = scmp.ne.s32.totalorder %s72_s28, %s1462_s16  ;;  %p1468_p9 = scmp.lt.s32.totalorder %s1462_s16, %s1462_s16 }
  0x4e   :  { %p1469_p10 = por %p1468_p9, %p1467_p8 }
  0x50   :  { %p1470_p11 = pnand %p1469_p10, %p1463_p7 }
  0x52   :  { %1473 = shalt.err (!%p1470_p11)
}
  0x53   :  { %77 = dma.hbm_to_vmem [thread:$0]  %s1861_s5, 1024, %s72_s28, [#allocation9], %s1578_s13, %s1578_s13, %s1579_s14  }
  0x54   :  { %1532 = dma.done.wait [#allocation3], 1024  }
  0x55   :  { %1533 = vsyncadd [#allocation3], 4294966272 }
  0x56   :  { %1534 = dma.done.wait [#allocation6], 2048  }
  0x57   :  { %1535 = vsyncadd [#allocation6], 4294965248 }
  0x58   :  { %1536 = dma.done.wait [#allocation9], 5120  }
  0x59   :  { %1537 = vsyncadd [#allocation9], 4294962176  ;;  %v1324_v0 = vld [vmem:[#allocation7] sm:$0xff]   ;;  %v1325_v1 = vld [vmem:[#allocation7 + $0x8] sm:$0xff]  }
  0x5a   :  { %1082 = vmatprep.subr.bf16.mxu0 %v1324_v0  ;;  %1210 = vmatprep.subr.bf16.mxu1 %v1324_v0  ;;  %v1326_v2 = vld [vmem:[#allocation7 + $0x10] sm:$0xff]   ;;  %v1327_v3 = vld [vmem:[#allocation7 + $0x18] sm:$0xff]   ;;  %v1332_v4 = vld [vmem:[#allocation5] sm:$0xff]  }
  0x5b   :  { %1083 = vmatpush3.bf16.msra.mxu0 %v1324_v0  ;;  %1218 = vmatpush3.bf16.msra.mxu1 %v1324_v0  ;;  %v1333_v5 = vld [vmem:[#allocation5 + $0x20] sm:$0xff]   ;;  %v1329_v7 = vld [vmem:[#allocation7 + $0x28] sm:$0xff]   ;;  %v1330_v8 = vld [vmem:[#allocation7 + $0x30] sm:$0xff]  }
  0x5c   :  { %1084 = vmatprep.subr.bf16.mxu0 %v1325_v1  ;;  %1211 = vmatprep.subr.bf16.mxu1 %v1325_v1  ;;  %v1328_v6 = vld [vmem:[#allocation7 + $0x20] sm:$0xff]   ;;  %v1331_v9 = vld [vmem:[#allocation7 + $0x38] sm:$0xff]   ;;  %v1334_v10 = vld [vmem:[#allocation5 + $0x8] sm:$0xff]  }
  0x5d   :  { %1098 = vmatprep.mubr.bf16.mxu0 %v1332_v4  ;;  %1106 = vmatprep.mubr.bf16.mxu1 %v1333_v5  ;;  %v1335_v11 = vld [vmem:[#allocation5 + $0x28] sm:$0xff]   ;;  %v1336_v12 = vld [vmem:[#allocation5 + $0x10] sm:$0xff]   ;;  %v1338_v14 = vld [vmem:[#allocation5 + $0x18] sm:$0xff]  }
  0x5e   :  { %v1337_v13 = vld [vmem:[#allocation5 + $0x30] sm:$0xff]   ;;  %v1339_v15 = vld [vmem:[#allocation5 + $0x38] sm:$0xff]   ;;  %v973_v16 = vld [vmem:[%s1859_s3] ss:$0 sm:$0xff]  ;;  %s1766_s3 = smov 0  }
  0x5f   :  { %1085 = vmatpush3.bf16.msra.mxu0 %v1325_v1  ;;  %1219 = vmatpush3.bf16.msra.mxu1 %v1325_v1 }
  0x60   :  { %1086 = vmatprep.subr.bf16.mxu0 %v1326_v2  ;;  %1212 = vmatprep.subr.bf16.mxu1 %v1326_v2 }
  0x63   :  { %1087 = vmatpush3.bf16.msra.mxu0 %v1326_v2  ;;  %1220 = vmatpush3.bf16.msra.mxu1 %v1326_v2 }
  0x64   :  { %1088 = vmatprep.subr.bf16.mxu0 %v1327_v3  ;;  %1213 = vmatprep.subr.bf16.mxu1 %v1327_v3 }
  0x67   :  { %1089 = vmatpush3.bf16.msra.mxu0 %v1327_v3  ;;  %1221 = vmatpush3.bf16.msra.mxu1 %v1327_v3 }
  0x68   :  { %1090 = vmatprep.subr.bf16.mxu0 %v1328_v6  ;;  %1214 = vmatprep.subr.bf16.mxu1 %v1328_v6 }
  0x6b   :  { %1091 = vmatpush3.bf16.msra.mxu0 %v1328_v6  ;;  %1222 = vmatpush3.bf16.msra.mxu1 %v1328_v6 }
  0x6c   :  { %1092 = vmatprep.subr.bf16.mxu0 %v1329_v7  ;;  %1215 = vmatprep.subr.bf16.mxu1 %v1329_v7 }
  0x6f   :  { %1093 = vmatpush3.bf16.msra.mxu0 %v1329_v7  ;;  %1223 = vmatpush3.bf16.msra.mxu1 %v1329_v7 }
  0x70   :  { %1094 = vmatprep.subr.bf16.mxu0 %v1330_v8  ;;  %1216 = vmatprep.subr.bf16.mxu1 %v1330_v8 }
  0x73   :  { %1095 = vmatpush3.bf16.msra.mxu0 %v1330_v8  ;;  %1224 = vmatpush3.bf16.msra.mxu1 %v1330_v8 }
  0x74   :  { %1096 = vmatprep.subr.bf16.mxu0 %v1331_v9  ;;  %1217 = vmatprep.subr.bf16.mxu1 %v1331_v9 }
  0x77   :  { %1097 = vmatpush3.bf16.msra.mxu0 %v1331_v9  ;;  %1225 = vmatpush3.bf16.msra.mxu1 %v1331_v9 }
  0x7a   :  { %1099 = vmatmul.mubr.bf16.vlgmr.msra.gmra.mrb[0].mxu0 %v1334_v10  ;;  %1107 = vmatmul.mubr.bf16.vlgmr.msra.gmra.mrb[0].mxu1 %v1335_v11 }
  0x7b   :  { %1102 = vmatprep.mubr.bf16.mxu0 %v1336_v12  ;;  %1110 = vmatprep.mubr.bf16.mxu1 %v1337_v13 }
  0x82   :  { %1103 = vmatmul.mubr.bf16.gmra.mrb[4].mxu0 %v1338_v14  ;;  %1111 = vmatmul.mubr.bf16.gmra.mrb[4].mxu1 %v1339_v15 }
 0x14d   :  { %v1100_v17 = vpop.f32.mrb[0].mxu0  ;;  %v1108_v18 = vpop.f32.mrb[0].mxu1 }
 0x14e   :  { %v274_v19 = vadd.f32 %v1100_v17, %v973_v16  ;;  %v306_v20 = vadd.f32 %v1108_v18, %v973_v16  ;;  %v265_v21 = vpop.f32.mrb[1].mxu0  ;;  %v297_v22 = vpop.f32.mrb[1].mxu1 }
 0x14f   :  { %v266_v23 = vadd.f32 %v973_v16, %v265_v21  ;;  %v298_v24 = vadd.f32 %v973_v16, %v297_v22  ;;  %v1101_v25 = vpop.f32.mrb[2].mxu0  ;;  %v1109_v26 = vpop.f32.mrb[2].mxu1 }
 0x150   :  { %v330_v27 = vmax.f32 %v274_v19, 0.0  ;;  %v338_v28 = vmax.f32 %v306_v20, 0.0  ;;  %v277_v29 = vadd.f32 %v1101_v25, %v973_v16  ;;  %v309_v30 = vadd.f32 %v1109_v26, %v973_v16  ;;  %v268_v31 = vpop.f32.mrb[3].mxu0  ;;  %v300_v32 = vpop.f32.mrb[3].mxu1 }
 0x151   :  { %v328_v33 = vmax.f32 %v266_v23, 0.0  ;;  %v336_v34 = vmax.f32 %v298_v24, 0.0  ;;  %v269_v35 = vadd.f32 %v973_v16, %v268_v31  ;;  %v301_v36 = vadd.f32 %v973_v16, %v300_v32 }
 0x152   :  { %v1718_v37 = vmul.f32 0.1, %v330_v27  ;;  %v1720_v38 = vmul.f32 0.1, %v338_v28  ;;  %v331_v39 = vmax.f32 %v277_v29, 0.0  ;;  %v339_v40 = vmax.f32 %v309_v30, 0.0 }
 0x153   :  { %v1722_v41 = vmul.f32 0.1, %v328_v33  ;;  %v1724_v42 = vmul.f32 0.1, %v336_v34  ;;  %v329_v43 = vmax.f32 %v269_v35, 0.0  ;;  %v337_v44 = vmax.f32 %v301_v36, 0.0 }
 0x154   :  { %v1726_v45 = vmul.f32 0.1, %v331_v39  ;;  %v361_v46 = vpack.c.bf16 %v331_v39, %v330_v27   ;;  %v1728_v47 = vmul.f32 0.1, %v339_v40  ;;  %v365_v48 = vpack.c.bf16 %v339_v40, %v338_v28  }
 0x155   :  { %v1730_v49 = vmul.f32 0.1, %v329_v43  ;;  %v360_v50 = vpack.c.bf16 %v329_v43, %v328_v33   ;;  %v1732_v51 = vmul.f32 0.1, %v337_v44  ;;  %v364_v52 = vpack.c.bf16 %v337_v44, %v336_v34   ;;  %v1104_v53 = vpop.f32.mrb[4].mxu0  ;;  %v1112_v54 = vpop.f32.mrb[4].mxu1 }
 0x156   :  { %v290_v55 = vadd.f32 %v1104_v53, %v973_v16  ;;  %v322_v56 = vadd.f32 %v1112_v54, %v973_v16  ;;  %v281_v57 = vpop.f32.mrb[5].mxu0  ;;  %v313_v58 = vpop.f32.mrb[5].mxu1 }
 0x157   :  { %v282_v59 = vadd.f32 %v973_v16, %v281_v57  ;;  %v314_v60 = vadd.f32 %v973_v16, %v313_v58  ;;  %v1105_v61 = vpop.f32.mrb[6].mxu0  ;;  %v1113_v62 = vpop.f32.mrb[6].mxu1 }
 0x158   :  { %v334_v63 = vmax.f32 %v290_v55, 0.0  ;;  %v342_v0 = vmax.f32 %v322_v56, 0.0  ;;  %v293_v1 = vadd.f32 %v1105_v61, %v973_v16  ;;  %v325_v2 = vadd.f32 %v1113_v62, %v973_v16  ;;  %v284_v3 = vpop.f32.mrb[7].mxu0  ;;  %v316_v4 = vpop.f32.mrb[7].mxu1 }
 0x159   :  { %v332_v5 = vmax.f32 %v282_v59, 0.0  ;;  %v340_v6 = vmax.f32 %v314_v60, 0.0  ;;  %v285_v7 = vadd.f32 %v973_v16, %v284_v3  ;;  %v317_v8 = vadd.f32 %v973_v16, %v316_v4 }
 0x15a   :  { %v1734_v9 = vmul.f32 0.1, %v334_v63  ;;  %v1736_v10 = vmul.f32 0.1, %v342_v0  ;;  %v335_v11 = vmax.f32 %v293_v1, 0.0  ;;  %v343_v12 = vmax.f32 %v325_v2, 0.0 }
 0x15b   :  { %v1738_v13 = vmul.f32 0.1, %v332_v5  ;;  %v1740_v14 = vmul.f32 0.1, %v340_v6  ;;  %v333_v15 = vmax.f32 %v285_v7, 0.0  ;;  %v341_v17 = vmax.f32 %v317_v8, 0.0 }
 0x15c   :  { %v1742_v18 = vmul.f32 0.1, %v335_v11  ;;  %v363_v19 = vpack.c.bf16 %v335_v11, %v334_v63   ;;  %v1744_v20 = vmul.f32 0.1, %v343_v12  ;;  %v367_v21 = vpack.c.bf16 %v343_v12, %v342_v0  }
 0x15d   :  { %v1746_v22 = vmul.f32 0.1, %v333_v15  ;;  %v362_v16 = vpack.c.bf16 %v333_v15, %v332_v5   ;;  %v1748_v23 = vmul.f32 0.1, %v341_v17  ;;  %v366_v24 = vpack.c.bf16 %v341_v17, %v340_v6  }
 0x15e LB: > { %v1340_v25 = vld [vmem:[#allocation2] sm:$0xff]   ;;  %1114 = vmatprep.subr.bf16.mxu0 %v1570_v50  ;;  %s1017_s14 = sshll.u32 %s1574_s3, 6  ;;  %v1341_v32 = vld [vmem:[#allocation2 + $0x8] sm:$0xff]   ;;  %v1342_v33 = vld [vmem:[#allocation2 + $0x10] sm:$0xff]   ;;  %s373_s3 = sadd.s32 1, %s1574_s3   ;;  %s1574_s3 = sphi %s1766_s3, %s373_s3   ;;  %v1570_v50 = vphi %v360_v50, %v1875_v50   ;;  %v1566_v46 = vphi %v361_v46, %v1874_v46   ;;  %v1562_v16 = vphi %v362_v16, %v1873_v16   ;;  %v1558_v19 = vphi %v363_v19, %v1872_v19   ;;  %v1554_v52 = vphi %v364_v52, %v1871_v52   ;;  %v1550_v48 = vphi %v365_v48, %v1870_v48   ;;  %v1546_v24 = vphi %v366_v24, %v1869_v24   ;;  %v1542_v21 = vphi %v367_v21, %v1868_v21  }
 0x15f   : > { %1130 = vmatprep.mubr.bf16.mxu0 %v1340_v25  ;;  %1115 = vmatpush3.bf16.msra.mxu0 %v1570_v50  ;;  %s1780_s4 = scalar_lea.vmem [#allocation8], %s1017_s14  ;;  %v1343_v34 = vld [vmem:[#allocation2 + $0x18] sm:$0xff]   ;;  %v1344_v35 = vld [vmem:[#allocation2 + $0x20] sm:$0xff]   ;;  %v1345_v36 = vld [vmem:[#allocation2 + $0x28] sm:$0xff]   ;;  %p370_p12 = scmp.ge.s32.totalorder %s373_s3, 4  }
 0x160   : > { %1116 = vmatprep.subr.bf16.mxu0 %v1566_v46  ;;  %v1348_v26 = vld [vmem:[%s1780_s4] sm:$0xff]   ;;  %v1349_v27 = vld [vmem:[%s1780_s4 + $0x8] sm:$0xff]   ;;  %v1350_v28 = vld [vmem:[%s1780_s4 + $0x10] sm:$0xff]  }
 0x161   : > { %1146 = vmatprep.subr.bf16.mxu1 %v1348_v26  ;;  %v1351_v29 = vld [vmem:[%s1780_s4 + $0x18] sm:$0xff]   ;;  %v1352_v30 = vld [vmem:[%s1780_s4 + $0x20] sm:$0xff]   ;;  %v1353_v31 = vld [vmem:[%s1780_s4 + $0x28] sm:$0xff]  }
 0x162   : > { %1147 = vmatpush3.bf16.msra.mxu1 %v1348_v26  ;;  %v1346_v39 = vld [vmem:[#allocation2 + $0x30] sm:$0xff]   ;;  %v1347_v40 = vld [vmem:[#allocation2 + $0x38] sm:$0xff]  }
 0x163   : > { %1117 = vmatpush3.bf16.msra.mxu0 %v1566_v46  ;;  %1148 = vmatprep.subr.bf16.mxu1 %v1349_v27  ;;  %v1354_v43 = vld [vmem:[%s1780_s4 + $0x30] sm:$0xff]   ;;  %v1355_v44 = vld [vmem:[%s1780_s4 + $0x38] sm:$0xff]  }
 0x164   : > { %1118 = vmatprep.subr.bf16.mxu0 %v1562_v16 }
 0x166   : > { %1149 = vmatpush3.bf16.msra.mxu1 %v1349_v27 }
 0x167   : > { %1119 = vmatpush3.bf16.msra.mxu0 %v1562_v16  ;;  %1150 = vmatprep.subr.bf16.mxu1 %v1350_v28 }
 0x168   : > { %1120 = vmatprep.subr.bf16.mxu0 %v1558_v19 }
 0x16a   : > { %1151 = vmatpush3.bf16.msra.mxu1 %v1350_v28 }
 0x16b   : > { %1121 = vmatpush3.bf16.msra.mxu0 %v1558_v19  ;;  %1152 = vmatprep.subr.bf16.mxu1 %v1351_v29 }
 0x16c   : > { %1122 = vmatprep.subr.bf16.mxu0 %v1554_v52 }
 0x16e   : > { %1153 = vmatpush3.bf16.msra.mxu1 %v1351_v29 }
 0x16f   : > { %1123 = vmatpush3.bf16.msra.mxu0 %v1554_v52  ;;  %1154 = vmatprep.subr.bf16.mxu1 %v1352_v30 }
 0x170   : > { %1124 = vmatprep.subr.bf16.mxu0 %v1550_v48 }
 0x172   : > { %1155 = vmatpush3.bf16.msra.mxu1 %v1352_v30 }
 0x173   : > { %1125 = vmatpush3.bf16.msra.mxu0 %v1550_v48  ;;  %1156 = vmatprep.subr.bf16.mxu1 %v1353_v31 }
 0x174   : > { %1126 = vmatprep.subr.bf16.mxu0 %v1546_v24 }
 0x176   : > { %1157 = vmatpush3.bf16.msra.mxu1 %v1353_v31 }
 0x177   : > { %1127 = vmatpush3.bf16.msra.mxu0 %v1546_v24  ;;  %1158 = vmatprep.subr.bf16.mxu1 %v1354_v43 }
 0x178   : > { %1128 = vmatprep.subr.bf16.mxu0 %v1542_v21 }
 0x17a   : > { %1159 = vmatpush3.bf16.msra.mxu1 %v1354_v43 }
 0x17b   : > { %1129 = vmatpush3.bf16.msra.mxu0 %v1542_v21  ;;  %1160 = vmatprep.subr.bf16.mxu1 %v1355_v44 }
 0x17e   : > { %1131 = vmatmul.mubr.bf16.vlgmr.msra.gmra.mrb[0].mxu0 %v1341_v32  ;;  %1161 = vmatpush3.bf16.msra.mxu1 %v1355_v44 }
 0x17f   : > { %1134 = vmatprep.mubr.bf16.mxu0 %v1342_v33 }
 0x186   : > { %1135 = vmatmul.mubr.bf16.gmra.mrb[4].mxu0 %v1343_v34 }
 0x187   : > { %1138 = vmatprep.mubr.bf16.mxu0 %v1344_v35 }
 0x18e   : > { %1139 = vmatmul.mubr.bf16.gmra.mrb[8].mxu0 %v1345_v36 }
 0x18f   : > { %1142 = vmatprep.mubr.bf16.mxu0 %v1346_v39 }
 0x196   : > { %1143 = vmatmul.mubr.bf16.gmra.mrb[12].mxu0 %v1347_v40 }
 0x251   : > { %v1132_v46 = vpop.f32.mrb[0].mxu0 }
 0x252   : > { %v480_v48 = vpop.f32.mrb[1].mxu0  ;;  %v489_v52 = vadd.f32 %v1132_v46, %v1718_v37  ;;  %v1360_v37 = vld [vmem:[#allocation10 + $0x20] sm:$0xff] (%p370_p12)  }
 0x253   : > { %v1133_v50 = vpop.f32.mrb[2].mxu0  ;;  %v481_v55 = vadd.f32 %v480_v48, %v1722_v41  ;;  %v1362_v41 = vld [vmem:[#allocation10 + $0x30] sm:$0xff] (%p370_p12)  }
 0x254   : > { %v492_v53 = vadd.f32 %v1133_v50, %v1726_v45  ;;  %v483_v54 = vpop.f32.mrb[3].mxu0  ;;  %v1008_v45 = vld [vmem:[%s1862_s6] ss:$0 sm:$0xff] (%p370_p12)  ;;  %s1583_s6 = smov (%p370_p12), [#allocation11]  }
 0x255   : > { %v484_v56 = vadd.f32 %v483_v54, %v1730_v49  ;;  %s928_s18 = sshll.u32 (%p370_p12), %s1583_s6, 4  ;;  %s929_s18 = int_to_ptr.vmem [resolvable:$true] %s928_s18 }
 0x256   : > { %v544_v57 = vpack.c.bf16 %v492_v53, %v489_v52  ;;  %s1474_s19 = scalar_lea.vmem (%p370_p12), %s929_s18, 2048  ;;  %p1479_p0 = scmp.lt.s32.totalorder (%p370_p12), %s929_s18, %s929_s18 }
 0x257   : > { %v543_v58 = vpack.c.bf16 %v484_v56, %v481_v55  ;;  %p1475_p13 = scmp.ne.s32.totalorder (%p370_p12), %s929_s18, %s1474_s19  ;;  %p1480_p1 = scmp.lt.s32.totalorder (%p370_p12), %s1474_s19, %s1474_s19 }
 0x259   : > { %v1136_v59 = vpop.f32.mrb[4].mxu0  ;;  %1162 = vmatprep.mubr.bf16.mxu1 %v543_v58  ;;  %p1481_p2 = por (%p370_p12), %p1480_p1, %p1479_p0 }
 0x25a   : > { %v496_v60 = vpop.f32.mrb[5].mxu0  ;;  %1163 = vmatmul.mubr.bf16.vlgmr.msra.gmra.mrb[0].mxu1 %v544_v57  ;;  %v505_v62 = vadd.f32 %v1136_v59, %v1734_v9 }
 0x25b   : > { %v1137_v61 = vpop.f32.mrb[6].mxu0  ;;  %v497_v1 = vadd.f32 %v496_v60, %v1738_v13  ;;  %p1482_p3 = pnand (%p370_p12), %p1481_p2, %p1475_p13 }
 0x25c   : > { %v508_v63 = vadd.f32 %v1137_v61, %v1742_v18  ;;  %v499_v0 = vpop.f32.mrb[7].mxu0 }
 0x25d   : > { %v500_v2 = vadd.f32 %v499_v0, %v1746_v22 }
 0x25e   : > { %v546_v3 = vpack.c.bf16 %v508_v63, %v505_v62 }
 0x25f   : > { %v545_v4 = vpack.c.bf16 %v500_v2, %v497_v1 }
 0x261   : > { %v1140_v5 = vpop.f32.mrb[8].mxu0  ;;  %1166 = vmatprep.mubr.bf16.mxu1 %v545_v4 }
 0x262   : > { %v512_v6 = vpop.f32.mrb[9].mxu0  ;;  %1167 = vmatmul.mubr.bf16.gmra.mrb[4].mxu1 %v546_v3  ;;  %v521_v8 = vadd.f32 %v1140_v5, %v1720_v38  ;;  %v1361_v38 = vld [vmem:[#allocation10 + $0x28] sm:$0xff] (%p370_p12)  }
 0x263   : > { %v1141_v7 = vpop.f32.mrb[10].mxu0  ;;  %v513_v15 = vadd.f32 %v512_v6, %v1724_v42  ;;  %v1363_v42 = vld [vmem:[#allocation10 + $0x38] sm:$0xff] (%p370_p12)  }
 0x264   : > { %v524_v11 = vadd.f32 %v1141_v7, %v1728_v47  ;;  %v515_v12 = vpop.f32.mrb[11].mxu0 }
 0x265   : > { %v516_v17 = vadd.f32 %v515_v12, %v1732_v51 }
 0x266   : > { %v548_v19 = vpack.c.bf16 %v524_v11, %v521_v8 }
 0x267   : > { %v547_v21 = vpack.c.bf16 %v516_v17, %v513_v15 }
 0x269   : > { %v1144_v16 = vpop.f32.mrb[12].mxu0  ;;  %1170 = vmatprep.mubr.bf16.mxu1 %v547_v21 }
 0x26a   : > { %v528_v24 = vpop.f32.mrb[13].mxu0  ;;  %1171 = vmatmul.mubr.bf16.gmra.mrb[8].mxu1 %v548_v19  ;;  %v537_v26 = vadd.f32 %v1144_v16, %v1736_v10 }
 0x26b   : > { %v1145_v25 = vpop.f32.mrb[14].mxu0  ;;  %v529_v29 = vadd.f32 %v528_v24, %v1740_v14 }
 0x26c   : > { %v540_v27 = vadd.f32 %v1145_v25, %v1744_v20  ;;  %v531_v28 = vpop.f32.mrb[15].mxu0 }
 0x26d   : > { %v532_v30 = vadd.f32 %v531_v28, %v1748_v23  ;;  %v1357_v28 = vld [vmem:[#allocation10 + $0x8] sm:$0xff] (%p370_p12)  }
 0x26e   : > { %v550_v31 = vpack.c.bf16 %v540_v27, %v537_v26  ;;  %v1356_v27 = vld [vmem:[#allocation10] sm:$0xff] (%p370_p12)  }
 0x26f   : > { %v549_v32 = vpack.c.bf16 %v532_v30, %v529_v29  ;;  %1178 = vmatprep.subr.bf16.mxu0 (%p370_p12), %v1356_v27  ;;  %1226 = vmatprep.subr.bf16.mxu1 (%p370_p12), %v1356_v27  ;;  %v1358_v29 = vld [vmem:[#allocation10 + $0x10] sm:$0xff] (%p370_p12)   ;;  %v1359_v30 = vld [vmem:[#allocation10 + $0x18] sm:$0xff] (%p370_p12)  }
 0x270   :  { %1179 = vmatpush3.bf16.msra.mxu0 (%p370_p12), %v1356_v27  ;;  %1234 = vmatpush3.bf16.msra.mxu1 (%p370_p12), %v1356_v27 }
 0x271   : > { %1174 = vmatprep.mubr.bf16.mxu1 %v549_v32  ;;  %1180 = vmatprep.subr.bf16.mxu0 (%p370_p12), %v1357_v28 }
 0x272   : > { %1175 = vmatmul.mubr.bf16.gmra.mrb[12].mxu1 %v550_v31  ;;  %1227 = vmatprep.subr.bf16.mxu1 (%p370_p12), %v1357_v28 }
 0x274   :  { %1181 = vmatpush3.bf16.msra.mxu0 (%p370_p12), %v1357_v28  ;;  %1235 = vmatpush3.bf16.msra.mxu1 (%p370_p12), %v1357_v28 }
 0x275   :  { %1182 = vmatprep.subr.bf16.mxu0 (%p370_p12), %v1358_v29  ;;  %1228 = vmatprep.subr.bf16.mxu1 (%p370_p12), %v1358_v29 }
 0x278   :  { %1183 = vmatpush3.bf16.msra.mxu0 (%p370_p12), %v1358_v29  ;;  %1236 = vmatpush3.bf16.msra.mxu1 (%p370_p12), %v1358_v29 }
 0x279   :  { %1184 = vmatprep.subr.bf16.mxu0 (%p370_p12), %v1359_v30  ;;  %1229 = vmatprep.subr.bf16.mxu1 (%p370_p12), %v1359_v30 }
 0x27c   :  { %1185 = vmatpush3.bf16.msra.mxu0 (%p370_p12), %v1359_v30  ;;  %1237 = vmatpush3.bf16.msra.mxu1 (%p370_p12), %v1359_v30 }
 0x27d   :  { %1186 = vmatprep.subr.bf16.mxu0 (%p370_p12), %v1360_v37  ;;  %1230 = vmatprep.subr.bf16.mxu1 (%p370_p12), %v1360_v37 }
 0x280   :  { %1187 = vmatpush3.bf16.msra.mxu0 (%p370_p12), %v1360_v37  ;;  %1238 = vmatpush3.bf16.msra.mxu1 (%p370_p12), %v1360_v37 }
 0x281   :  { %1188 = vmatprep.subr.bf16.mxu0 (%p370_p12), %v1361_v38  ;;  %1231 = vmatprep.subr.bf16.mxu1 (%p370_p12), %v1361_v38 }
 0x284   :  { %1189 = vmatpush3.bf16.msra.mxu0 (%p370_p12), %v1361_v38  ;;  %1239 = vmatpush3.bf16.msra.mxu1 (%p370_p12), %v1361_v38 }
 0x285   :  { %1190 = vmatprep.subr.bf16.mxu0 (%p370_p12), %v1362_v41  ;;  %1232 = vmatprep.subr.bf16.mxu1 (%p370_p12), %v1362_v41 }
 0x288   :  { %1191 = vmatpush3.bf16.msra.mxu0 (%p370_p12), %v1362_v41  ;;  %1240 = vmatpush3.bf16.msra.mxu1 (%p370_p12), %v1362_v41 }
 0x289   :  { %1192 = vmatprep.subr.bf16.mxu0 (%p370_p12), %v1363_v42  ;;  %1233 = vmatprep.subr.bf16.mxu1 (%p370_p12), %v1363_v42 }
 0x28c   :  { %1193 = vmatpush3.bf16.msra.mxu0 (%p370_p12), %v1363_v42  ;;  %1241 = vmatpush3.bf16.msra.mxu1 (%p370_p12), %v1363_v42 }
 0x32d   : > { %v1164_v33 = vpop.f32.mrb[0].mxu1 }
 0x32e   : > { %v652_v34 = vpop.f32.mrb[1].mxu1  ;;  %v717_v36 = vmax.f32 %v1164_v33, 0.0 }
 0x32f   : > { %v1165_v35 = vpop.f32.mrb[2].mxu1  ;;  %v715_v43 = vmax.f32 %v652_v34, 0.0 }
 0x330   : > { %v718_v39 = vmax.f32 %v1165_v35, 0.0  ;;  %v655_v40 = vpop.f32.mrb[3].mxu1 }
 0x331   : > { %v716_v44 = vmax.f32 %v655_v40, 0.0 }
 0x332   : > { %v1806_v46 = vpack.c.bf16 %v718_v39, %v717_v36  }
 0x333   : > { %v731_v54 = vpack.c.bf16 %v716_v44, %v715_v43  }
 0x334   : > { %v1864_v53 = vmov %v1806_v46 }
 0x335   : > { %v1168_v48 = vpop.f32.mrb[4].mxu1  ;;  %1194 = vmatprep.mubr.bf16.mxu0 (%p370_p12), %v731_v54 }
 0x336   : > { %v668_v50 = vpop.f32.mrb[5].mxu1  ;;  %v721_v55 = vmax.f32 %v1168_v48, 0.0  ;;  %1195 = vmatmul.mubr.bf16.vlgmr.msra.gmra.mrb[0].mxu0 (%p370_p12), %v1864_v53 }
 0x337   : > { %v1169_v52 = vpop.f32.mrb[6].mxu1  ;;  %v719_v58 = vmax.f32 %v668_v50, 0.0  ;;  %v1875_v50 = vmov %v731_v54 }
 0x338   : > { %v722_v56 = vmax.f32 %v1169_v52, 0.0  ;;  %v671_v57 = vpop.f32.mrb[7].mxu1 }
 0x339   : > { %v720_v59 = vmax.f32 %v671_v57, 0.0 }
 0x33a   : > { %v1808_v19 = vpack.c.bf16 %v722_v56, %v721_v55  }
 0x33b   : > { %v1810_v16 = vpack.c.bf16 %v720_v59, %v719_v58  }
 0x33c   : > { %v1865_v60 = vmov %v1808_v19 }
 0x33d   : > { %v1866_v61 = vmov %v1810_v16  ;;  %v1172_v62 = vpop.f32.mrb[8].mxu1 }
 0x33e   : > { %v684_v63 = vpop.f32.mrb[9].mxu1  ;;  %v725_v1 = vmax.f32 %v1172_v62, 0.0  ;;  %v1873_v16 = vmov %v1866_v61  ;;  %1198 = vmatprep.mubr.bf16.mxu0 (%p370_p12), %v1866_v61 }
 0x33f   : > { %v1173_v0 = vpop.f32.mrb[10].mxu1  ;;  %v723_v46 = vmax.f32 %v684_v63, 0.0  ;;  %1199 = vmatmul.mubr.bf16.gmra.mrb[4].mxu0 (%p370_p12), %v1865_v60 }
 0x340   : > { %v726_v2 = vmax.f32 %v1173_v0, 0.0  ;;  %v687_v3 = vpop.f32.mrb[11].mxu1 }
 0x341   : > { %v724_v4 = vmax.f32 %v687_v3, 0.0 }
 0x342   : > { %v1812_v48 = vpack.c.bf16 %v726_v2, %v725_v1  }
 0x343   : > { %v735_v6 = vpack.c.bf16 %v724_v4, %v723_v46   ;;  %v1874_v46 = vmov %v1864_v53 }
 0x344   : > { %v1867_v5 = vmov %v1812_v48 }
 0x345   : > { %v1176_v7 = vpop.f32.mrb[12].mxu1  ;;  %v1870_v48 = vmov %v1867_v5  ;;  %v1871_v52 = vmov %v735_v6  ;;  %1202 = vmatprep.mubr.bf16.mxu1 (%p370_p12), %v735_v6 }
 0x346   : > { %v700_v8 = vpop.f32.mrb[13].mxu1  ;;  %v729_v12 = vmax.f32 %v1176_v7, 0.0  ;;  %1203 = vmatmul.mubr.bf16.vlgmr.msra.gmra.mrb[0].mxu1 (%p370_p12), %v1867_v5 }
 0x347   : > { %v1177_v11 = vpop.f32.mrb[14].mxu1  ;;  %v727_v19 = vmax.f32 %v700_v8, 0.0  ;;  %372 = sbr.rel (!%p370_p12) target bundleno = 350 (0x15e), region = 76 }
 0x348   : > { %v730_v15 = vmax.f32 %v1177_v11, 0.0  ;;  %v703_v17 = vpop.f32.mrb[15].mxu1 }
 0x349   : > { %v728_v21 = vmax.f32 %v703_v17, 0.0 }
 0x34a   : > { %v738_v25 = vpack.c.bf16 %v730_v15, %v729_v12  }
 0x34b   : > { %v737_v26 = vpack.c.bf16 %v728_v21, %v727_v19   ;;  %v1872_v19 = vmov %v1865_v60 }
 0x34c   : > { %v1868_v21 = vmov %v738_v25 }
 0x34d   : > { %v1869_v24 = vmov %v737_v26  ;;  %1206 = vmatprep.mubr.bf16.mxu1 (%p370_p12), %v737_v26 }
 0x34e   :  { %1207 = vmatmul.mubr.bf16.gmra.mrb[4].mxu1 %v738_v25 }
 0x409   :  { %v1196_v47 = vpop.f32.mrb[0].mxu0 }
 0x40a   :  { %v853_v51 = vadd.f32 %v1196_v47, %v1008_v45  ;;  %v844_v10 = vpop.f32.mrb[1].mxu0 }
 0x40b   :  { %v845_v14 = vadd.f32 %v1008_v45, %v844_v10  ;;  %v1197_v20 = vpop.f32.mrb[2].mxu0 }
 0x40c   :  { %909 = vst [vmem:[#allocation11 + $0x10] sm:$0xff] %v853_v51  ;;  %v856_v23 = vadd.f32 %v1197_v20, %v1008_v45  ;;  %v847_v24 = vpop.f32.mrb[3].mxu0 }
 0x40d   :  { %907 = vst [vmem:[#allocation11] sm:$0xff] %v845_v14  ;;  %v848_v32 = vadd.f32 %v1008_v45, %v847_v24 }
 0x40e   :  { %910 = vst [vmem:[#allocation11 + $0x18] sm:$0xff] %v856_v23 }
 0x40f   :  { %908 = vst [vmem:[#allocation11 + $0x8] sm:$0xff] %v848_v32 }
 0x412   :  { %v1200_v34 = vpop.f32.mrb[4].mxu0 }
 0x413   :  { %v869_v36 = vadd.f32 %v1200_v34, %v1008_v45  ;;  %v860_v40 = vpop.f32.mrb[5].mxu0 }
 0x414   :  { %v861_v44 = vadd.f32 %v1008_v45, %v860_v40  ;;  %v1201_v54 = vpop.f32.mrb[6].mxu0 }
 0x415   :  { %913 = vst [vmem:[#allocation11 + $0x30] sm:$0xff] %v869_v36  ;;  %v872_v50 = vadd.f32 %v1201_v54, %v1008_v45  ;;  %v863_v55 = vpop.f32.mrb[7].mxu0 }
 0x416   :  { %911 = vst [vmem:[#allocation11 + $0x20] sm:$0xff] %v861_v44  ;;  %v864_v57 = vadd.f32 %v1008_v45, %v863_v55 }
 0x417   :  { %914 = vst [vmem:[#allocation11 + $0x38] sm:$0xff] %v872_v50 }
 0x418   :  { %912 = vst [vmem:[#allocation11 + $0x28] sm:$0xff] %v864_v57 }
 0x419   :  { %v1204_v49 = vpop.f32.mrb[0].mxu1 }
 0x41a   :  { %v885_v9 = vadd.f32 %v1204_v49, %v1008_v45  ;;  %v876_v13 = vpop.f32.mrb[1].mxu1 }
 0x41b   :  { %v877_v18 = vadd.f32 %v1008_v45, %v876_v13  ;;  %v1205_v22 = vpop.f32.mrb[2].mxu1 }
 0x41c   :  { %917 = vst [vmem:[#allocation11 + $0x50] sm:$0xff] %v885_v9  ;;  %v888_v16 = vadd.f32 %v1205_v22, %v1008_v45  ;;  %v879_v31 = vpop.f32.mrb[3].mxu1 }
 0x41d   :  { %915 = vst [vmem:[#allocation11 + $0x40] sm:$0xff] %v877_v18  ;;  %v880_v33 = vadd.f32 %v1008_v45, %v879_v31 }
 0x41e   :  { %918 = vst [vmem:[#allocation11 + $0x58] sm:$0xff] %v888_v16 }
 0x41f   :  { %916 = vst [vmem:[#allocation11 + $0x48] sm:$0xff] %v880_v33 }
 0x421   :  { %v1208_v35 = vpop.f32.mrb[4].mxu1 }
 0x422   :  { %v901_v39 = vadd.f32 %v1208_v35, %v1008_v45  ;;  %v892_v43 = vpop.f32.mrb[5].mxu1 }
 0x423   :  { %v893_v53 = vadd.f32 %v1008_v45, %v892_v43  ;;  %v1209_v48 = vpop.f32.mrb[6].mxu1 }
 0x424   :  { %921 = vst [vmem:[#allocation11 + $0x70] sm:$0xff] %v901_v39  ;;  %v904_v52 = vadd.f32 %v1209_v48, %v1008_v45  ;;  %v895_v56 = vpop.f32.mrb[7].mxu1 }
 0x425   :  { %919 = vst [vmem:[#allocation11 + $0x60] sm:$0xff] %v893_v53  ;;  %v896_v58 = vadd.f32 %v1008_v45, %v895_v56 }
 0x426   :  { %922 = vst [vmem:[#allocation11 + $0x78] sm:$0xff] %v904_v52 }
 0x427   :  { %920 = vst [vmem:[#allocation11 + $0x68] sm:$0xff] %v896_v58 }
 0x428   :  { %1485 = shalt.err (!%p1482_p3)
}
 0x429   :  { %s1486_s22 = scalar_lea.hbm %s1863_s7, 2048 }
 0x42a   :  { %p1487_p4 = scmp.ne.s32.totalorder %s1863_s7, %s1486_s22  ;;  %p1490_p5 = scmp.lt.u32.totalorder %s1486_s22, %s1863_s7 }
 0x42c   :  { %p1492_p6 = pnand %p1490_p5, %p1487_p4 }
 0x42e   :  { %1495 = shalt.err (!%p1492_p6)
}
 0x42f   :  { %s1584_s25 = smov 128   ;;  %s1585_s26 = smov 8  }
 0x430   :  { %934 = dma.vmem_to_hbm [thread:$0]  %s929_s18, 2048, %s1863_s7, [#allocation4], %s1584_s25, %s1584_s25, %s1585_s26  }
 0x431   :  { %1538 = dma.done.wait [#allocation4], 2048  }
 0x432   :  { %1539 = vsyncadd [#allocation4], 4294965248 }
 0x433   :  { %938 = vsyncpa [#allocation3], 1 }
 0x434   :  { %939 = vsyncpa [#allocation6], 1 }
 0x435   :  { %940 = vsyncpa [#allocation9], 1 }
 0x436   :  { %941 = vsyncpa [#allocation4], 1 }

</bundles_post_ra>
